<compile_context>
chip_gen: v7x
topology: tpu7x:2x2x1
jax: 0.10.0
libtpu: 0.0.40
codegen_flags: <defaults>
</compile_context>

<pallas_src>
import jax
import jax.numpy as jnp
from jax.experimental import pallas as pl
from jax.experimental.pallas import tpu as pltpu

N_HIDDEN = 5      # true hidden width of the MLP
H_PAD = 8         # zero-padded hidden width (multiple-of-8 sublane friendly)


def _make_kernel(TB, N, H):
    def kernel(x_ref, w1_ref, wh_ref, b_ref, adj_ref, o_ref):
        # x_ref block: (TB*N, D) -> TB bags of N instances each.
        x = x_ref[...]
        h = jnp.maximum(
            jnp.dot(x, w1_ref[...], preferred_element_type=jnp.float32) + b_ref[0:1, :], 0.0)
        h = jnp.maximum(
            jnp.dot(h, wh_ref[0], preferred_element_type=jnp.float32) + b_ref[1:2, :], 0.0)
        h = jnp.maximum(
            jnp.dot(h, wh_ref[1], preferred_element_type=jnp.float32) + b_ref[2:3, :], 0.0)
        h = jnp.maximum(
            jnp.dot(h, wh_ref[2], preferred_element_type=jnp.float32) + b_ref[3:4, :], 0.0)
        s = jnp.dot(h, wh_ref[3], preferred_element_type=jnp.float32) + b_ref[4:5, :]  # (TB*N, H)
        # MIL pooling (assumed max over instances); only column 0 is a real score.
        pooled = jnp.max(s.reshape(TB, N, H), axis=1)            # (TB, H)
        # adjuster: Linear(1,1) on the bag log-odds (scalars from SMEM).
        o_ref[0] = adj_ref[0] * pooled + adj_ref[1]              # (TB, H); col 0 valid
    return kernel


def _pick_tb(B, N, D, target_bytes=4 << 20):
    """Largest divisor of B whose (TB*N, D) f32 input block stays under target."""
    per_bag = max(N * D * 4, 1)
    tb = max(1, min(B, target_bytes // per_bag))
    while B % tb:
        tb -= 1
    return tb


def prepare_params(params):
    """One-time packing/padding of the torch-style params for the kernel."""
    (w1, b1, w2, b2, w3, b3, w4, b4, w5, b5, aw, ab) = params
    D = w1.shape[0]

    def pad_w(w):
        w = jnp.asarray(w, jnp.float32)
        return jnp.zeros((H_PAD, H_PAD), jnp.float32).at[:w.shape[0], :w.shape[1]].set(w)

    def pad_b(b):
        b = jnp.asarray(b, jnp.float32).reshape(-1)
        return jnp.zeros((H_PAD,), jnp.float32).at[:b.shape[0]].set(b)

    w1p = jnp.zeros((D, H_PAD), jnp.float32).at[:, :w1.shape[1]].set(
        jnp.asarray(w1, jnp.float32))
    whp = jnp.stack([pad_w(w2), pad_w(w3), pad_w(w4), pad_w(w5)], axis=0)       # (4, H, H)
    bp = jnp.stack([pad_b(b1), pad_b(b2), pad_b(b3), pad_b(b4), pad_b(b5)], 0)  # (5, H)
    adj = jnp.stack([jnp.asarray(aw, jnp.float32).reshape(()),
                     jnp.asarray(ab, jnp.float32).reshape(())])                 # (2,)
    return w1p, whp, bp, adj


def adjusted_alinear_mil(x_bxyd, prepared):
    """x_bxyd: (B, X, Y, n_input) float32. Returns (B, 1) float32."""
    w1p, whp, bp, adj = prepared
    B, X, Y, D = x_bxyd.shape
    N = X * Y
    assert N % 8 == 0, "instance count must be a multiple of 8 for this tiling"

    TB = _pick_tb(B, N, D)
    G = B // TB
    x2 = x_bxyd.reshape(B * N, D).astype(jnp.float32)   # features unpadded

    weight_bytes = int(w1p.size + whp.size + bp.size + adj.size) * 4
    cost = pl.CostEstimate(
        flops=2 * B * N * (N_HIDDEN * D + 3 * N_HIDDEN * N_HIDDEN + N_HIDDEN) + 2 * B,
        transcendentals=0,
        bytes_accessed=B * N * D * 4 + weight_bytes + B * H_PAD * 4,
    )

    grid_spec = pltpu.PrefetchScalarGridSpec(
        num_scalar_prefetch=0,
        grid=(G,),
        in_specs=[
            pl.BlockSpec((TB * N, D), lambda g: (g, 0)),        # TB bags per step
            pl.BlockSpec((D, H_PAD), lambda g: (0, 0)),         # layer-1 weight
            pl.BlockSpec((4, H_PAD, H_PAD), lambda g: (0, 0, 0)),  # stacked hidden weights
            pl.BlockSpec((5, H_PAD), lambda g: (0, 0)),         # stacked biases
            pl.BlockSpec(memory_space=pltpu.MemorySpace.SMEM),  # adjuster (aw, ab)
        ],
        out_specs=pl.BlockSpec((1, TB, H_PAD), lambda g: (g, 0, 0)),
    )

    out = pl.pallas_call(
        _make_kernel(TB, N, H_PAD),
        out_shape=jax.ShapeDtypeStruct((G, TB, H_PAD), jnp.float32),
        grid_spec=grid_spec,
        compiler_params=pltpu.CompilerParams(dimension_semantics=("parallel",)),
        cost_estimate=cost,
    )(x2, w1p, whp, bp, adj)

    return out.reshape(B, H_PAD)[:, 0:1]


def ref_forward(x_bxyd, params):
    """Pure-JAX reference of AdjustedALinearMIL.forward."""
    (w1, b1, w2, b2, w3, b3, w4, b4, w5, b5, aw, ab) = params
    B, X, Y, D = x_bxyd.shape
    h = x_bxyd.reshape(B, X * Y, D)
    h = jax.nn.relu(h @ w1 + b1)
    h = jax.nn.relu(h @ w2 + b2)
    h = jax.nn.relu(h @ w3 + b3)
    h = jax.nn.relu(h @ w4 + b4)
    s = h @ w5 + b5                      # (B, N, 1) instance log-odds
    pooled = jnp.max(s, axis=1)          # (B, 1)   XYMILPool (assumed max over instances)
    return pooled * aw + ab              # adjuster Linear(1,1)


def init_params(key, n_input):
    """Deterministic params; mirrors torch.nn.Linear default U(-1/sqrt(fan_in), +)."""
    dims = [(n_input, N_HIDDEN), (N_HIDDEN, N_HIDDEN), (N_HIDDEN, N_HIDDEN),
            (N_HIDDEN, N_HIDDEN), (N_HIDDEN, 1)]
    keys = jax.random.split(key, 2 * len(dims) + 2)
    params = []
    for i, (fin, fout) in enumerate(dims):
        bound = 1.0 / jnp.sqrt(fin)
        w = jax.random.uniform(keys[2 * i], (fin, fout), jnp.float32, -bound, bound)
        b = jax.random.uniform(keys[2 * i + 1], (fout,), jnp.float32, -bound, bound)
        params += [w, b]
    aw = jax.random.uniform(keys[-2], (), jnp.float32, -1.0, 1.0)   # adjuster Linear(1,1)
    ab = jax.random.uniform(keys[-1], (), jnp.float32, -1.0, 1.0)
    params += [aw, ab]
    return tuple(params)


if __name__ == "__main__":
    key = jax.random.PRNGKey(0)
    kx, kp = jax.random.split(key)

    B, X, Y, D = 2, 8, 8, 16            # 2 bags of 8x8 = 64 instances, 16 features each
    x = jax.random.normal(kx, (B, X, Y, D), jnp.float32)
    params = init_params(kp, D)
    prepared = prepare_params(params)   # weight packing hoisted out of the hot wrapper

    out = jax.block_until_ready(adjusted_alinear_mil(x, prepared))
    ref = jax.block_until_ready(ref_forward(x, params))

    assert out.shape == (B, 1)
    assert jnp.allclose(out, ref, atol=1e-4, rtol=1e-4), (out, ref)
    print("KERNEL_OK")
</pallas_src>

<mosaic_0001>
module attributes {stable_mosaic.version = 11 : i64} {
  func.func @kernel(%arg0: i32, %arg1: memref<128x16xf32, #tpu.memory_space<vmem>>, %arg2: memref<16x8xf32, #tpu.memory_space<vmem>>, %arg3: memref<4x8x8xf32, #tpu.memory_space<vmem>>, %arg4: memref<5x8xf32, #tpu.memory_space<vmem>>, %arg5: memref<2xf32, #tpu.memory_space<smem>>, %arg6: memref<1x2x8xf32, #tpu.memory_space<vmem>>) attributes {dimension_semantics = [#tpu.dimension_semantics<parallel>], iteration_bounds = array<i64: 1>, scalar_prefetch = 0 : i64, scratch_operands = 0 : i64, tpu.core_type = #tpu.core_type<tc>, window_params = [{transform_indices = @transform_0, window_bounds = array<i64: 128, 16>}, {pipeline_mode = #tpu.pipeline_mode<synchronous>, transform_indices = @transform_1, window_bounds = array<i64: 16, 8>}, {pipeline_mode = #tpu.pipeline_mode<synchronous>, transform_indices = @transform_2, window_bounds = array<i64: 4, 8, 8>}, {pipeline_mode = #tpu.pipeline_mode<synchronous>, transform_indices = @transform_3, window_bounds = array<i64: 5, 8>}, {transform_indices = @transform_4, window_bounds = array<i64: 2>}, {transform_indices = @transform_5, window_bounds = array<i64: 1, 2, 8>}]} {
    %c0 = arith.constant 0 : index
    %c0_0 = arith.constant 0 : index
    %0 = vector.load %arg1[%c0, %c0_0] : memref<128x16xf32, #tpu.memory_space<vmem>>, vector<128x16xf32>
    %c0_1 = arith.constant 0 : index
    %c0_2 = arith.constant 0 : index
    %1 = vector.load %arg2[%c0_1, %c0_2] : memref<16x8xf32, #tpu.memory_space<vmem>>, vector<16x8xf32>
    %cst = arith.constant dense<0.000000e+00> : vector<128x8xf32>
    %2 = tpu.matmul %0, %1, %cst {dimension_numbers = #tpu.dot_dimension_numbers<[1], [0], [0], [1], [0, 0, 1, 1], [], []>} : vector<128x16xf32>, vector<16x8xf32>, vector<128x8xf32> -> vector<128x8xf32>
    %c0_3 = arith.constant 0 : index
    %c0_4 = arith.constant 0 : index
    %3 = vector.load %arg4[%c0_3, %c0_4] : memref<5x8xf32, #tpu.memory_space<vmem>>, vector<1x8xf32>
    %4 = vector.broadcast %3 : vector<1x8xf32> to vector<128x8xf32>
    %5 = arith.addf %2, %4 : vector<128x8xf32>
    %cst_5 = arith.constant 0.000000e+00 : f32
    %6 = vector.broadcast %cst_5 : f32 to vector<128x8xf32>
    %7 = arith.maximumf %5, %6 : vector<128x8xf32>
    %c0_6 = arith.constant 0 : index
    %c0_7 = arith.constant 0 : index
    %c0_8 = arith.constant 0 : index
    %8 = vector.load %arg3[%c0_6, %c0_7, %c0_8] : memref<4x8x8xf32, #tpu.memory_space<vmem>>, vector<1x8x8xf32>
    %9 = vector.shape_cast %8 : vector<1x8x8xf32> to vector<8x8xf32>
    %cst_9 = arith.constant dense<0.000000e+00> : vector<128x8xf32>
    %10 = tpu.matmul %7, %9, %cst_9 {dimension_numbers = #tpu.dot_dimension_numbers<[1], [0], [0], [1], [0, 0, 1, 1], [], []>} : vector<128x8xf32>, vector<8x8xf32>, vector<128x8xf32> -> vector<128x8xf32>
    %c1 = arith.constant 1 : index
    %c0_10 = arith.constant 0 : index
    %11 = vector.load %arg4[%c1, %c0_10] : memref<5x8xf32, #tpu.memory_space<vmem>>, vector<1x8xf32>
    %12 = vector.broadcast %11 : vector<1x8xf32> to vector<128x8xf32>
    %13 = arith.addf %10, %12 : vector<128x8xf32>
    %cst_11 = arith.constant 0.000000e+00 : f32
    %14 = vector.broadcast %cst_11 : f32 to vector<128x8xf32>
    %15 = arith.maximumf %13, %14 : vector<128x8xf32>
    %c1_12 = arith.constant 1 : index
    %c0_13 = arith.constant 0 : index
    %c0_14 = arith.constant 0 : index
    %16 = vector.load %arg3[%c1_12, %c0_13, %c0_14] : memref<4x8x8xf32, #tpu.memory_space<vmem>>, vector<1x8x8xf32>
    %17 = vector.shape_cast %16 : vector<1x8x8xf32> to vector<8x8xf32>
    %cst_15 = arith.constant dense<0.000000e+00> : vector<128x8xf32>
    %18 = tpu.matmul %15, %17, %cst_15 {dimension_numbers = #tpu.dot_dimension_numbers<[1], [0], [0], [1], [0, 0, 1, 1], [], []>} : vector<128x8xf32>, vector<8x8xf32>, vector<128x8xf32> -> vector<128x8xf32>
    %c2 = arith.constant 2 : index
    %c0_16 = arith.constant 0 : index
    %19 = vector.load %arg4[%c2, %c0_16] : memref<5x8xf32, #tpu.memory_space<vmem>>, vector<1x8xf32>
    %20 = vector.broadcast %19 : vector<1x8xf32> to vector<128x8xf32>
    %21 = arith.addf %18, %20 : vector<128x8xf32>
    %cst_17 = arith.constant 0.000000e+00 : f32
    %22 = vector.broadcast %cst_17 : f32 to vector<128x8xf32>
    %23 = arith.maximumf %21, %22 : vector<128x8xf32>
    %c2_18 = arith.constant 2 : index
    %c0_19 = arith.constant 0 : index
    %c0_20 = arith.constant 0 : index
    %24 = vector.load %arg3[%c2_18, %c0_19, %c0_20] : memref<4x8x8xf32, #tpu.memory_space<vmem>>, vector<1x8x8xf32>
    %25 = vector.shape_cast %24 : vector<1x8x8xf32> to vector<8x8xf32>
    %cst_21 = arith.constant dense<0.000000e+00> : vector<128x8xf32>
    %26 = tpu.matmul %23, %25, %cst_21 {dimension_numbers = #tpu.dot_dimension_numbers<[1], [0], [0], [1], [0, 0, 1, 1], [], []>} : vector<128x8xf32>, vector<8x8xf32>, vector<128x8xf32> -> vector<128x8xf32>
    %c3 = arith.constant 3 : index
    %c0_22 = arith.constant 0 : index
    %27 = vector.load %arg4[%c3, %c0_22] : memref<5x8xf32, #tpu.memory_space<vmem>>, vector<1x8xf32>
    %28 = vector.broadcast %27 : vector<1x8xf32> to vector<128x8xf32>
    %29 = arith.addf %26, %28 : vector<128x8xf32>
    %cst_23 = arith.constant 0.000000e+00 : f32
    %30 = vector.broadcast %cst_23 : f32 to vector<128x8xf32>
    %31 = arith.maximumf %29, %30 : vector<128x8xf32>
    %c3_24 = arith.constant 3 : index
    %c0_25 = arith.constant 0 : index
    %c0_26 = arith.constant 0 : index
    %32 = vector.load %arg3[%c3_24, %c0_25, %c0_26] : memref<4x8x8xf32, #tpu.memory_space<vmem>>, vector<1x8x8xf32>
    %33 = vector.shape_cast %32 : vector<1x8x8xf32> to vector<8x8xf32>
    %cst_27 = arith.constant dense<0.000000e+00> : vector<128x8xf32>
    %34 = tpu.matmul %31, %33, %cst_27 {dimension_numbers = #tpu.dot_dimension_numbers<[1], [0], [0], [1], [0, 0, 1, 1], [], []>} : vector<128x8xf32>, vector<8x8xf32>, vector<128x8xf32> -> vector<128x8xf32>
    %c4 = arith.constant 4 : index
    %c0_28 = arith.constant 0 : index
    %35 = vector.load %arg4[%c4, %c0_28] : memref<5x8xf32, #tpu.memory_space<vmem>>, vector<1x8xf32>
    %36 = vector.broadcast %35 : vector<1x8xf32> to vector<128x8xf32>
    %37 = arith.addf %34, %36 : vector<128x8xf32>
    %38 = vector.shape_cast %37 : vector<128x8xf32> to vector<2x64x8xf32>
    %cst_29 = arith.constant dense<0xFF800000> : vector<2x8xf32>
    %39 = vector.multi_reduction <maximumf>, %38, %cst_29 [1] : vector<2x64x8xf32> to vector<2x8xf32>
    %c0_30 = arith.constant 0 : index
    %40 = memref.load %arg5[%c0_30] : memref<2xf32, #tpu.memory_space<smem>>
    %41 = vector.broadcast %40 : f32 to vector<2x8xf32>
    %42 = arith.mulf %41, %39 : vector<2x8xf32>
    %c1_31 = arith.constant 1 : index
    %43 = memref.load %arg5[%c1_31] : memref<2xf32, #tpu.memory_space<smem>>
    %44 = vector.broadcast %43 : f32 to vector<2x8xf32>
    %45 = arith.addf %42, %44 : vector<2x8xf32>
    %c0_32 = arith.constant 0 : index
    %c0_33 = arith.constant 0 : index
    %c0_34 = arith.constant 0 : index
    %46 = vector.load %arg6[%c0_32, %c0_33, %c0_34] : memref<1x2x8xf32, #tpu.memory_space<vmem>>, vector<1x2x8xf32>
    %47 = vector.shape_cast %46 : vector<1x2x8xf32> to vector<2x8xf32>
    %48 = vector.shape_cast %45 : vector<2x8xf32> to vector<1x2x8xf32>
    tpu.vector_store %arg6[%c0_32, %c0_33, %c0_34], %48 {strides = array<i32>} : memref<1x2x8xf32, #tpu.memory_space<vmem>>, vector<1x2x8xf32>,
    return
  }
  func.func @transform_0(%arg0: i32) -> (i32, i32) {
    %c0_i32 = arith.constant 0 : i32
    %c0_i32_0 = arith.constant 0 : i32
    return %arg0, %c0_i32 : i32, i32
  }
  func.func @transform_1(%arg0: i32) -> (i32, i32) {
    %c0_i32 = arith.constant 0 : i32
    %c0_i32_0 = arith.constant 0 : i32
    %c0_i32_1 = arith.constant 0 : i32
    return %c0_i32, %c0_i32_0 : i32, i32
  }
  func.func @transform_2(%arg0: i32) -> (i32, i32, i32) {
    %c0_i32 = arith.constant 0 : i32
    %c0_i32_0 = arith.constant 0 : i32
    %c0_i32_1 = arith.constant 0 : i32
    %c0_i32_2 = arith.constant 0 : i32
    return %c0_i32, %c0_i32_0, %c0_i32_1 : i32, i32, i32
  }
  func.func @transform_3(%arg0: i32) -> (i32, i32) {
    %c0_i32 = arith.constant 0 : i32
    %c0_i32_0 = arith.constant 0 : i32
    %c0_i32_1 = arith.constant 0 : i32
    return %c0_i32, %c0_i32_0 : i32, i32
  }
  func.func @transform_4(%arg0: i32) -> i32 {
    %c0_i32 = arith.constant 0 : i32
    %c0_i32_0 = arith.constant 0 : i32
    return %c0_i32 : i32
  }
  func.func @transform_5(%arg0: i32) -> (i32, i32, i32) {
    %c0_i32 = arith.constant 0 : i32
    %c0_i32_0 = arith.constant 0 : i32
    %c0_i32_1 = arith.constant 0 : i32
    return %arg0, %c0_i32, %c0_i32_0 : i32, i32, i32
  }
}

</mosaic_0001>

<bundles_post_ra>
// kernel: tpu_custom_call.1
= control target key start
LH: loop header
LB: loop body
LE: loop exit
PB: predicated region body
PF: predicated region fallthrough
CT: control target
= control target key end

     0   :  { %10 = vsyncpa [#allocation4], 0  ;;  %s1764_s0 = inlined_call_operand.vmem [shape: f32[128,16], index: 0, kind: input, shape index: {}]   ;;  %s1765_s1 = inlined_call_operand.vmem [shape: f32[16,8], index: 1, kind: input, shape index: {}]   ;;  %s1766_s2 = inlined_call_operand.vmem [shape: f32[4,8,8], index: 2, kind: input, shape index: {}]   ;;  %s1767_s3 = inlined_call_operand.vmem [shape: f32[5,8], index: 3, kind: input, shape index: {}]   ;;  %s1768_s4 = inlined_call_operand.vmem [shape: f32[2], index: 4, kind: input, shape index: {}]   ;;  %s1769_s5 = inlined_call_operand.hbm [shape: f32[1,2,8], index: 5, kind: output, shape index: {}]  }
   0x1   :  { %11 = vsyncpa [#allocation3], 0  ;;  %s26_s20 = sshll.u32 %s1768_s4, 4  ;;  %s27_s20 = int_to_ptr.vmem [resolvable:$true] %s26_s20 }
   0x2   :  { %s1502_s21 = scalar_lea.vmem %s27_s20, 16  ;;  %p1507_p1 = scmp.lt.s32.totalorder %s27_s20, %s27_s20 }
   0x3   :  { %p1503_p0 = scmp.ne.s32.totalorder %s27_s20, %s1502_s21  ;;  %p1508_p2 = scmp.lt.s32.totalorder %s1502_s21, %s1502_s21 }
   0x5   :  { %p1509_p3 = por %p1508_p2, %p1507_p1 }
   0x7   :  { %p1510_p4 = pnand %p1509_p3, %p1503_p0 }
   0x9   :  { %1513 = shalt.err (!%p1510_p4)
}
   0xa   :  { %s1540_s22 = smov [#allocation2]  }
   0xb   :  { %29 = dma.vmem_to_smem %s27_s20, 16, %s1540_s22, [#allocation4]  }
   0xc   :  { %1536 = dma.done.wait [#allocation4], 16  }
   0xd   :  { %1537 = vsyncadd [#allocation4], 4294967280 }
   0xe   :  { %33 = sfence }
   0xf   :  { %v50_v0 = vld [vmem:[%s1765_s1] sm:$0xff]  ;;  %v51_v1 = vld [vmem:[%s1765_s1 + $0x8] sm:$0xff]  ;;  %vm57_vm0 = vcmask 130048   ;;  %v36_v5 = vld [vmem:[%s1764_s0 + $0x10] sm:$0xff]  ;;  %vm273_vm1 = vcmask 64512   ;;  %s1275_s21 = sld [smem:[#allocation2 + $0x1]] }
  0x10   :  { %v34_v2 = vld [vmem:[%s1764_s0] sm:$0xff]  ;;  %v1494_v3 = vpack.c.bf16 %v51_v1, %v50_v0  ;;  %v35_v4 = vld [vmem:[%s1764_s0 + $0x8] sm:$0xff]  ;;  %v37_v7 = vld [vmem:[%s1764_s0 + $0x18] sm:$0xff]  ;;  %s1541_s22 = smov [#allocation5]   ;;  %vm1167_vm2 = vcmask 1041409   ;;  %vm1170_vm3 = vcmask 58368  }
  0x11   :  { %1366 = vmatprep.mubr.msk.f32.mxu0 %vm57_vm0, %v34_v2  ;;  %v267_v6 = vld [vmem:[%s1766_s2] sm:$0xff]  ;;  %v39_v9 = vld [vmem:[%s1764_s0 + $0x28] sm:$0xff]  ;;  %v40_v10 = vld [vmem:[%s1764_s0 + $0x30] sm:$0xff]  ;;  %s1178_s23 = sshll.u32 %s1541_s22, 4  ;;  %s1179_s23 = int_to_ptr.vmem [resolvable:$true] %s1178_s23 }
  0x12   :  { %1495 = vmatprep.subr.bf16.mxu0 %v1494_v3  ;;  %v38_v8 = vld [vmem:[%s1764_s0 + $0x20] sm:$0xff]  ;;  %1498 = vmatprep.subr.mxu1 %v267_v6  ;;  %v41_v11 = vld [vmem:[%s1764_s0 + $0x38] sm:$0xff]  ;;  %v43_v13 = vld [vmem:[%s1764_s0 + $0x48] sm:$0xff]  ;;  %s1514_s24 = scalar_lea.vmem %s1179_s23, 32  ;;  %p1519_p6 = scmp.lt.s32.totalorder %s1179_s23, %s1179_s23 }
  0x13   :  { %1497 = vmatpush3.bf16.msra.mxu0 %v1494_v3  ;;  %1499 = vmatpush3.msra.mxu1 %v267_v6  ;;  %v42_v12 = vld [vmem:[%s1764_s0 + $0x40] sm:$0xff]  ;;  %v44_v14 = vld [vmem:[%s1764_s0 + $0x50] sm:$0xff]  ;;  %v45_v15 = vld [vmem:[%s1764_s0 + $0x58] sm:$0xff]  ;;  %p1515_p5 = scmp.ne.s32.totalorder %s1179_s23, %s1514_s24  ;;  %p1520_p7 = scmp.lt.s32.totalorder %s1514_s24, %s1514_s24 }
  0x14   :  { %1390 = vmatprep.subr.mxu0 %v267_v6  ;;  %v46_v16 = vld [vmem:[%s1764_s0 + $0x60] sm:$0xff]  ;;  %v47_v17 = vld [vmem:[%s1764_s0 + $0x68] sm:$0xff]  ;;  %v48_v18 = vld [vmem:[%s1764_s0 + $0x70] sm:$0xff] }
  0x15   :  { %v49_v19 = vld [vmem:[%s1764_s0 + $0x78] sm:$0xff]  ;;  %v1221_v20 = vld [vmem:[%s1766_s2 + $0x8] sm:$0xff]  ;;  %v1187_v21 = vld [vmem:[%s1767_s3] ss:$0 sm:$0xff]  ;;  %p1521_p8 = por %p1520_p7, %p1519_p6 }
  0x16   :  { %1367 = vmatmul.mubr.msk.f32.vlgmr.msra.gmra.mrb[0].mxu0 %vm57_vm0, %v35_v4  ;;  %1416 = vmatprep.subr.mxu1 %v1221_v20 }
  0x17   :  { %1369 = vmatprep.mubr.msk.f32.mxu0 %vm57_vm0, %v36_v5  ;;  %1391 = vmatpush3.msra.mxu0 %v267_v6  ;;  %v1239_v6 = vld [vmem:[%s1766_s2 + $0x10] sm:$0xff]  ;;  %p1522_p9 = pnand %p1521_p8, %p1515_p5 }
  0x18   :  { %1442 = vmatprep.subr.mxu0 %v1239_v6 }
  0x1a   :  { %1370 = vmatmul.mubr.msk.f32.gmra.mrb[2].mxu0 %vm57_vm0, %v37_v7  ;;  %v1204_v7 = vld [vmem:[%s1767_s3 + $0x1] ss:$0 sm:$0xff] }
  0x1b   :  { %1372 = vmatprep.mubr.msk.f32.mxu0 %vm57_vm0, %v38_v8 }
  0x1e   :  { %1373 = vmatmul.mubr.msk.f32.gmra.mrb[4].mxu0 %vm57_vm0, %v39_v9 }
  0x1f   :  { %1375 = vmatprep.mubr.msk.f32.mxu0 %vm57_vm0, %v40_v10 }
  0x22   :  { %1376 = vmatmul.mubr.msk.f32.gmra.mrb[6].mxu0 %vm57_vm0, %v41_v11 }
  0x23   :  { %1378 = vmatprep.mubr.msk.f32.mxu0 %vm57_vm0, %v42_v12 }
  0x26   :  { %1379 = vmatmul.mubr.msk.f32.gmra.mrb[8].mxu0 %vm57_vm0, %v43_v13 }
  0x27   :  { %1381 = vmatprep.mubr.msk.f32.mxu0 %vm57_vm0, %v44_v14 }
  0x2a   :  { %1382 = vmatmul.mubr.msk.f32.gmra.mrb[10].mxu0 %vm57_vm0, %v45_v15 }
  0x2b   :  { %1384 = vmatprep.mubr.msk.f32.mxu0 %vm57_vm0, %v46_v16 }
  0x2e   :  { %1385 = vmatmul.mubr.msk.f32.gmra.mrb[12].mxu0 %vm57_vm0, %v47_v17 }
  0x2f   :  { %1387 = vmatprep.mubr.msk.f32.mxu0 %vm57_vm0, %v48_v18 }
  0x32   :  { %1388 = vmatmul.mubr.msk.f32.gmra.mrb[14].mxu0 %vm57_vm0, %v49_v19 }
  0xe9   :  { %v1368_v22 = vpop.f32.mrb[0].mxu0 }
  0xea   :  { %v178_v23 = vadd.f32 %v1368_v22, %v1187_v21  ;;  %v172_v24 = vpop.f32.mrb[1].mxu0 }
  0xeb   :  { %v173_v25 = vadd.f32 %v1187_v21, %v172_v24 }
  0xec   :  { %v252_v28 = vmax.f32 %v178_v23, 0.0 }
  0xed   :  { %v251_v26 = vmax.f32 %v173_v25, 0.0  ;;  %v1371_v27 = vpop.f32.mrb[2].mxu0 }
  0xee   :  { %v188_v29 = vadd.f32 %v1371_v27, %v1187_v21  ;;  %v182_v30 = vpop.f32.mrb[3].mxu0 }
  0xef   :  { %v183_v31 = vadd.f32 %v1187_v21, %v182_v30  ;;  %1392 = vmatprep.mubr.msk.f32.mxu0 %vm273_vm1, %v251_v26 }
  0xf0   :  { %1393 = vmatmul.mubr.msk.f32.vlgmr.msra.gmra.mrb[16].mxu0 %vm273_vm1, %v252_v28  ;;  %v254_v34 = vmax.f32 %v188_v29, 0.0 }
  0xf1   :  { %v253_v32 = vmax.f32 %v183_v31, 0.0  ;;  %v1374_v33 = vpop.f32.mrb[4].mxu0  ;;  %1443 = vmatpush3.msra.mxu0 %v1239_v6 }
  0xf2   :  { %v198_v35 = vadd.f32 %v1374_v33, %v1187_v21  ;;  %v192_v36 = vpop.f32.mrb[5].mxu0 }
  0xf3   :  { %v193_v37 = vadd.f32 %v1187_v21, %v192_v36  ;;  %1395 = vmatprep.mubr.msk.f32.mxu0 %vm273_vm1, %v253_v32 }
  0xf4   :  { %1396 = vmatmul.mubr.msk.f32.gmra.mrb[18].mxu0 %vm273_vm1, %v254_v34  ;;  %v256_v40 = vmax.f32 %v198_v35, 0.0 }
  0xf5   :  { %v255_v38 = vmax.f32 %v193_v37, 0.0  ;;  %v1377_v39 = vpop.f32.mrb[6].mxu0 }
  0xf6   :  { %v208_v41 = vadd.f32 %v1377_v39, %v1187_v21  ;;  %v202_v42 = vpop.f32.mrb[7].mxu0 }
  0xf7   :  { %v203_v43 = vadd.f32 %v1187_v21, %v202_v42  ;;  %1398 = vmatprep.mubr.msk.f32.mxu0 %vm273_vm1, %v255_v38 }
  0xf8   :  { %1399 = vmatmul.mubr.msk.f32.gmra.mrb[20].mxu0 %vm273_vm1, %v256_v40  ;;  %v258_v46 = vmax.f32 %v208_v41, 0.0 }
  0xf9   :  { %v257_v44 = vmax.f32 %v203_v43, 0.0  ;;  %v1380_v45 = vpop.f32.mrb[8].mxu0 }
  0xfa   :  { %v218_v47 = vadd.f32 %v1380_v45, %v1187_v21  ;;  %v212_v48 = vpop.f32.mrb[9].mxu0 }
  0xfb   :  { %v213_v49 = vadd.f32 %v1187_v21, %v212_v48  ;;  %1401 = vmatprep.mubr.msk.f32.mxu1 %vm273_vm1, %v257_v44 }
  0xfc   :  { %1402 = vmatmul.mubr.msk.f32.vlgmr.msra.gmra.mrb[0].mxu1 %vm273_vm1, %v258_v46  ;;  %v260_v52 = vmax.f32 %v218_v47, 0.0 }
  0xfd   :  { %v259_v50 = vmax.f32 %v213_v49, 0.0  ;;  %v1383_v51 = vpop.f32.mrb[10].mxu0  ;;  %1417 = vmatpush3.msra.mxu1 %v1221_v20 }
  0xfe   :  { %v228_v53 = vadd.f32 %v1383_v51, %v1187_v21  ;;  %v222_v54 = vpop.f32.mrb[11].mxu0 }
  0xff   :  { %v223_v55 = vadd.f32 %v1187_v21, %v222_v54  ;;  %1404 = vmatprep.mubr.msk.f32.mxu1 %vm273_vm1, %v259_v50 }
 0x100   :  { %1405 = vmatmul.mubr.msk.f32.gmra.mrb[2].mxu1 %vm273_vm1, %v260_v52  ;;  %v262_v58 = vmax.f32 %v228_v53, 0.0 }
 0x101   :  { %v261_v56 = vmax.f32 %v223_v55, 0.0  ;;  %v1386_v57 = vpop.f32.mrb[12].mxu0 }
 0x102   :  { %v238_v59 = vadd.f32 %v1386_v57, %v1187_v21  ;;  %v232_v60 = vpop.f32.mrb[13].mxu0  ;;  %v1222_v57 = vld [vmem:[%s1767_s3 + $0x2] ss:$0 sm:$0xff] }
 0x103   :  { %v233_v61 = vadd.f32 %v1187_v21, %v232_v60  ;;  %1407 = vmatprep.mubr.msk.f32.mxu1 %vm273_vm1, %v261_v56  ;;  %v1257_v56 = vld [vmem:[%s1766_s2 + $0x18] sm:$0xff] }
 0x104   :  { %1408 = vmatmul.mubr.msk.f32.gmra.mrb[4].mxu1 %vm273_vm1, %v262_v58  ;;  %v264_v0 = vmax.f32 %v238_v59, 0.0  ;;  %1468 = vmatprep.subr.mxu1 %v1257_v56 }
 0x105   :  { %v263_v62 = vmax.f32 %v233_v61, 0.0  ;;  %v1389_v63 = vpop.f32.mrb[14].mxu0 }
 0x106   :  { %v248_v1 = vadd.f32 %v1389_v63, %v1187_v21  ;;  %v242_v2 = vpop.f32.mrb[15].mxu0 }
 0x107   :  { %v243_v3 = vadd.f32 %v1187_v21, %v242_v2  ;;  %1410 = vmatprep.mubr.msk.f32.mxu1 %vm273_vm1, %v263_v62 }
 0x108   :  { %1411 = vmatmul.mubr.msk.f32.gmra.mrb[6].mxu1 %vm273_vm1, %v264_v0  ;;  %v266_v5 = vmax.f32 %v248_v1, 0.0 }
 0x109   :  { %v265_v4 = vmax.f32 %v243_v3, 0.0 }
 0x10b   :  { %1413 = vmatprep.mubr.msk.f32.mxu1 %vm273_vm1, %v265_v4 }
 0x10c   :  { %1414 = vmatmul.mubr.msk.f32.gmra.mrb[8].mxu1 %vm273_vm1, %v266_v5 }
 0x1c3   :  { %v1394_v8 = vpop.f32.mrb[16].mxu0 }
 0x1c4   :  { %v394_v9 = vadd.f32 %v1394_v8, %v1204_v7  ;;  %v388_v10 = vpop.f32.mrb[17].mxu0 }
 0x1c5   :  { %v389_v11 = vadd.f32 %v1204_v7, %v388_v10 }
 0x1c6   :  { %v468_v14 = vmax.f32 %v394_v9, 0.0 }
 0x1c7   :  { %v467_v12 = vmax.f32 %v389_v11, 0.0  ;;  %v1397_v13 = vpop.f32.mrb[18].mxu0 }
 0x1c8   :  { %v404_v15 = vadd.f32 %v1397_v13, %v1204_v7  ;;  %v398_v16 = vpop.f32.mrb[19].mxu0 }
 0x1c9   :  { %v399_v17 = vadd.f32 %v1204_v7, %v398_v16  ;;  %1418 = vmatprep.mubr.msk.f32.mxu1 %vm273_vm1, %v467_v12 }
 0x1ca   :  { %1419 = vmatmul.mubr.msk.f32.vlgmr.msra.gmra.mrb[10].mxu1 %vm273_vm1, %v468_v14  ;;  %v470_v20 = vmax.f32 %v404_v15, 0.0 }
 0x1cb   :  { %v469_v18 = vmax.f32 %v399_v17, 0.0  ;;  %v1400_v19 = vpop.f32.mrb[20].mxu0  ;;  %1469 = vmatpush3.msra.mxu1 %v1257_v56 }
 0x1cc   :  { %v414_v21 = vadd.f32 %v1400_v19, %v1204_v7  ;;  %v408_v22 = vpop.f32.mrb[21].mxu0 }
 0x1cd   :  { %v409_v23 = vadd.f32 %v1204_v7, %v408_v22  ;;  %1421 = vmatprep.mubr.msk.f32.mxu1 %vm273_vm1, %v469_v18 }
 0x1ce   :  { %1422 = vmatmul.mubr.msk.f32.gmra.mrb[12].mxu1 %vm273_vm1, %v470_v20  ;;  %v472_v26 = vmax.f32 %v414_v21, 0.0 }
 0x1cf   :  { %v471_v24 = vmax.f32 %v409_v23, 0.0  ;;  %v1403_v25 = vpop.f32.mrb[0].mxu1 }
 0x1d0   :  { %v424_v27 = vadd.f32 %v1403_v25, %v1204_v7  ;;  %v418_v28 = vpop.f32.mrb[1].mxu1 }
 0x1d1   :  { %v419_v29 = vadd.f32 %v1204_v7, %v418_v28  ;;  %1424 = vmatprep.mubr.msk.f32.mxu1 %vm273_vm1, %v471_v24 }
 0x1d2   :  { %1425 = vmatmul.mubr.msk.f32.gmra.mrb[14].mxu1 %vm273_vm1, %v472_v26  ;;  %v474_v32 = vmax.f32 %v424_v27, 0.0 }
 0x1d3   :  { %v473_v30 = vmax.f32 %v419_v29, 0.0  ;;  %v1406_v31 = vpop.f32.mrb[2].mxu1 }
 0x1d4   :  { %v434_v33 = vadd.f32 %v1406_v31, %v1204_v7  ;;  %v428_v34 = vpop.f32.mrb[3].mxu1 }
 0x1d5   :  { %v429_v35 = vadd.f32 %v1204_v7, %v428_v34  ;;  %1427 = vmatprep.mubr.msk.f32.mxu1 %vm273_vm1, %v473_v30 }
 0x1d6   :  { %1428 = vmatmul.mubr.msk.f32.gmra.mrb[16].mxu1 %vm273_vm1, %v474_v32  ;;  %v476_v38 = vmax.f32 %v434_v33, 0.0 }
 0x1d7   :  { %v475_v36 = vmax.f32 %v429_v35, 0.0  ;;  %v1409_v37 = vpop.f32.mrb[4].mxu1 }
 0x1d8   :  { %v444_v39 = vadd.f32 %v1409_v37, %v1204_v7  ;;  %v438_v40 = vpop.f32.mrb[5].mxu1 }
 0x1d9   :  { %v439_v41 = vadd.f32 %v1204_v7, %v438_v40  ;;  %1430 = vmatprep.mubr.msk.f32.mxu1 %vm273_vm1, %v475_v36 }
 0x1da   :  { %1431 = vmatmul.mubr.msk.f32.gmra.mrb[18].mxu1 %vm273_vm1, %v476_v38  ;;  %v478_v44 = vmax.f32 %v444_v39, 0.0 }
 0x1db   :  { %v477_v42 = vmax.f32 %v439_v41, 0.0  ;;  %v1412_v43 = vpop.f32.mrb[6].mxu1 }
 0x1dc   :  { %v454_v45 = vadd.f32 %v1412_v43, %v1204_v7  ;;  %v448_v46 = vpop.f32.mrb[7].mxu1 }
 0x1dd   :  { %v449_v47 = vadd.f32 %v1204_v7, %v448_v46  ;;  %1433 = vmatprep.mubr.msk.f32.mxu1 %vm273_vm1, %v477_v42  ;;  %v1240_v42 = vld [vmem:[%s1767_s3 + $0x3] ss:$0 sm:$0xff] }
 0x1de   :  { %1434 = vmatmul.mubr.msk.f32.gmra.mrb[20].mxu1 %vm273_vm1, %v478_v44  ;;  %v480_v50 = vmax.f32 %v454_v45, 0.0 }
 0x1df   :  { %v479_v48 = vmax.f32 %v449_v47, 0.0  ;;  %v1415_v49 = vpop.f32.mrb[8].mxu1 }
 0x1e0   :  { %v464_v51 = vadd.f32 %v1415_v49, %v1204_v7  ;;  %v458_v52 = vpop.f32.mrb[9].mxu1 }
 0x1e1   :  { %v459_v53 = vadd.f32 %v1204_v7, %v458_v52  ;;  %1436 = vmatprep.mubr.msk.f32.mxu1 %vm273_vm1, %v479_v48 }
 0x1e2   :  { %1437 = vmatmul.mubr.msk.f32.gmra.mrb[22].mxu1 %vm273_vm1, %v480_v50  ;;  %v482_v55 = vmax.f32 %v464_v51, 0.0 }
 0x1e3   :  { %v481_v54 = vmax.f32 %v459_v53, 0.0 }
 0x1e5   :  { %1439 = vmatprep.mubr.msk.f32.mxu1 %vm273_vm1, %v481_v54 }
 0x1e6   :  { %1440 = vmatmul.mubr.msk.f32.gmra.mrb[24].mxu1 %vm273_vm1, %v482_v55 }
 0x29d   :  { %v1420_v58 = vpop.f32.mrb[10].mxu1 }
 0x29e   :  { %v610_v59 = vadd.f32 %v1420_v58, %v1222_v57  ;;  %v604_v60 = vpop.f32.mrb[11].mxu1 }
 0x29f   :  { %v605_v61 = vadd.f32 %v1222_v57, %v604_v60 }
 0x2a0   :  { %v684_v0 = vmax.f32 %v610_v59, 0.0 }
 0x2a1   :  { %v683_v62 = vmax.f32 %v605_v61, 0.0  ;;  %v1423_v63 = vpop.f32.mrb[12].mxu1 }
 0x2a2   :  { %v620_v1 = vadd.f32 %v1423_v63, %v1222_v57  ;;  %v614_v2 = vpop.f32.mrb[13].mxu1 }
 0x2a3   :  { %v615_v3 = vadd.f32 %v1222_v57, %v614_v2  ;;  %1444 = vmatprep.mubr.msk.f32.mxu0 %vm273_vm1, %v683_v62 }
 0x2a4   :  { %1445 = vmatmul.mubr.msk.f32.vlgmr.msra.gmra.mrb[22].mxu0 %vm273_vm1, %v684_v0  ;;  %v686_v6 = vmax.f32 %v620_v1, 0.0 }
 0x2a5   :  { %v685_v4 = vmax.f32 %v615_v3, 0.0  ;;  %v1426_v5 = vpop.f32.mrb[14].mxu1 }
 0x2a6   :  { %v630_v7 = vadd.f32 %v1426_v5, %v1222_v57  ;;  %v624_v8 = vpop.f32.mrb[15].mxu1 }
 0x2a7   :  { %v625_v9 = vadd.f32 %v1222_v57, %v624_v8  ;;  %1447 = vmatprep.mubr.msk.f32.mxu0 %vm273_vm1, %v685_v4 }
 0x2a8   :  { %1448 = vmatmul.mubr.msk.f32.gmra.mrb[24].mxu0 %vm273_vm1, %v686_v6  ;;  %v688_v12 = vmax.f32 %v630_v7, 0.0 }
 0x2a9   :  { %v687_v10 = vmax.f32 %v625_v9, 0.0  ;;  %v1429_v11 = vpop.f32.mrb[16].mxu1 }
 0x2aa   :  { %v640_v13 = vadd.f32 %v1429_v11, %v1222_v57  ;;  %v634_v14 = vpop.f32.mrb[17].mxu1 }
 0x2ab   :  { %v635_v15 = vadd.f32 %v1222_v57, %v634_v14  ;;  %1450 = vmatprep.mubr.msk.f32.mxu0 %vm273_vm1, %v687_v10 }
 0x2ac   :  { %1451 = vmatmul.mubr.msk.f32.gmra.mrb[26].mxu0 %vm273_vm1, %v688_v12  ;;  %v690_v18 = vmax.f32 %v640_v13, 0.0 }
 0x2ad   :  { %v689_v16 = vmax.f32 %v635_v15, 0.0  ;;  %v1432_v17 = vpop.f32.mrb[18].mxu1 }
 0x2ae   :  { %v650_v19 = vadd.f32 %v1432_v17, %v1222_v57  ;;  %v644_v20 = vpop.f32.mrb[19].mxu1 }
 0x2af   :  { %v645_v21 = vadd.f32 %v1222_v57, %v644_v20  ;;  %1453 = vmatprep.mubr.msk.f32.mxu0 %vm273_vm1, %v689_v16 }
 0x2b0   :  { %1454 = vmatmul.mubr.msk.f32.gmra.mrb[28].mxu0 %vm273_vm1, %v690_v18  ;;  %v692_v24 = vmax.f32 %v650_v19, 0.0 }
 0x2b1   :  { %v691_v22 = vmax.f32 %v645_v21, 0.0  ;;  %v1435_v23 = vpop.f32.mrb[20].mxu1 }
 0x2b2   :  { %v660_v25 = vadd.f32 %v1435_v23, %v1222_v57  ;;  %v654_v26 = vpop.f32.mrb[21].mxu1 }
 0x2b3   :  { %v655_v27 = vadd.f32 %v1222_v57, %v654_v26  ;;  %1456 = vmatprep.mubr.msk.f32.mxu0 %vm273_vm1, %v691_v22 }
 0x2b4   :  { %1457 = vmatmul.mubr.msk.f32.gmra.mrb[30].mxu0 %vm273_vm1, %v692_v24  ;;  %v694_v30 = vmax.f32 %v660_v25, 0.0 }
 0x2b5   :  { %v693_v28 = vmax.f32 %v655_v27, 0.0  ;;  %v1438_v29 = vpop.f32.mrb[22].mxu1 }
 0x2b6   :  { %v670_v31 = vadd.f32 %v1438_v29, %v1222_v57  ;;  %v664_v32 = vpop.f32.mrb[23].mxu1 }
 0x2b7   :  { %v665_v33 = vadd.f32 %v1222_v57, %v664_v32  ;;  %1459 = vmatprep.mubr.msk.f32.mxu0 %vm273_vm1, %v693_v28  ;;  %v1258_v28 = vld [vmem:[%s1767_s3 + $0x4] ss:$0 sm:$0xff]  ;;  %s1157_s3 = sld [smem:[#allocation2]] }
 0x2b8   :  { %1460 = vmatmul.mubr.msk.f32.gmra.mrb[32].mxu0 %vm273_vm1, %v694_v30  ;;  %v696_v36 = vmax.f32 %v670_v31, 0.0 }
 0x2b9   :  { %v695_v34 = vmax.f32 %v665_v33, 0.0  ;;  %v1441_v35 = vpop.f32.mrb[24].mxu1 }
 0x2ba   :  { %v680_v37 = vadd.f32 %v1441_v35, %v1222_v57  ;;  %v674_v38 = vpop.f32.mrb[25].mxu1 }
 0x2bb   :  { %v675_v39 = vadd.f32 %v1222_v57, %v674_v38  ;;  %1462 = vmatprep.mubr.msk.f32.mxu0 %vm273_vm1, %v695_v34 }
 0x2bc   :  { %1463 = vmatmul.mubr.msk.f32.gmra.mrb[34].mxu0 %vm273_vm1, %v696_v36  ;;  %v698_v41 = vmax.f32 %v680_v37, 0.0 }
 0x2bd   :  { %v697_v40 = vmax.f32 %v675_v39, 0.0 }
 0x2bf   :  { %1465 = vmatprep.mubr.msk.f32.mxu0 %vm273_vm1, %v697_v40 }
 0x2c0   :  { %1466 = vmatmul.mubr.msk.f32.gmra.mrb[36].mxu0 %vm273_vm1, %v698_v41 }
 0x377   :  { %v1446_v43 = vpop.f32.mrb[22].mxu0 }
 0x378   :  { %v826_v44 = vadd.f32 %v1446_v43, %v1240_v42  ;;  %v820_v45 = vpop.f32.mrb[23].mxu0 }
 0x379   :  { %v821_v46 = vadd.f32 %v1240_v42, %v820_v45 }
 0x37a   :  { %v900_v49 = vmax.f32 %v826_v44, 0.0 }
 0x37b   :  { %v899_v47 = vmax.f32 %v821_v46, 0.0  ;;  %v1449_v48 = vpop.f32.mrb[24].mxu0 }
 0x37c   :  { %v836_v50 = vadd.f32 %v1449_v48, %v1240_v42  ;;  %v830_v51 = vpop.f32.mrb[25].mxu0 }
 0x37d   :  { %v831_v52 = vadd.f32 %v1240_v42, %v830_v51  ;;  %1470 = vmatprep.mubr.msk.f32.mxu1 %vm273_vm1, %v899_v47 }
 0x37e   :  { %1471 = vmatmul.mubr.msk.f32.vlgmr.msra.gmra.mrb[26].mxu1 %vm273_vm1, %v900_v49  ;;  %v902_v55 = vmax.f32 %v836_v50, 0.0 }
 0x37f   :  { %v901_v53 = vmax.f32 %v831_v52, 0.0  ;;  %v1452_v54 = vpop.f32.mrb[26].mxu0 }
 0x380   :  { %v846_v56 = vadd.f32 %v1452_v54, %v1240_v42  ;;  %v840_v57 = vpop.f32.mrb[27].mxu0 }
 0x381   :  { %v841_v58 = vadd.f32 %v1240_v42, %v840_v57  ;;  %1473 = vmatprep.mubr.msk.f32.mxu1 %vm273_vm1, %v901_v53 }
 0x382   :  { %1474 = vmatmul.mubr.msk.f32.gmra.mrb[28].mxu1 %vm273_vm1, %v902_v55  ;;  %v904_v61 = vmax.f32 %v846_v56, 0.0 }
 0x383   :  { %v903_v59 = vmax.f32 %v841_v58, 0.0  ;;  %v1455_v60 = vpop.f32.mrb[28].mxu0 }
 0x384   :  { %v856_v62 = vadd.f32 %v1455_v60, %v1240_v42  ;;  %v850_v63 = vpop.f32.mrb[29].mxu0 }
 0x385   :  { %v851_v0 = vadd.f32 %v1240_v42, %v850_v63  ;;  %1476 = vmatprep.mubr.msk.f32.mxu1 %vm273_vm1, %v903_v59 }
 0x386   :  { %1477 = vmatmul.mubr.msk.f32.gmra.mrb[30].mxu1 %vm273_vm1, %v904_v61  ;;  %v906_v3 = vmax.f32 %v856_v62, 0.0 }
 0x387   :  { %v905_v1 = vmax.f32 %v851_v0, 0.0  ;;  %v1458_v2 = vpop.f32.mrb[30].mxu0 }
 0x388   :  { %v866_v4 = vadd.f32 %v1458_v2, %v1240_v42  ;;  %v860_v5 = vpop.f32.mrb[31].mxu0 }
 0x389   :  { %v861_v6 = vadd.f32 %v1240_v42, %v860_v5  ;;  %1479 = vmatprep.mubr.msk.f32.mxu1 %vm273_vm1, %v905_v1 }
 0x38a   :  { %1480 = vmatmul.mubr.msk.f32.gmra.mrb[32].mxu1 %vm273_vm1, %v906_v3  ;;  %v908_v9 = vmax.f32 %v866_v4, 0.0 }
 0x38b   :  { %v907_v7 = vmax.f32 %v861_v6, 0.0  ;;  %v1461_v8 = vpop.f32.mrb[32].mxu0 }
 0x38c   :  { %v876_v10 = vadd.f32 %v1461_v8, %v1240_v42  ;;  %v870_v11 = vpop.f32.mrb[33].mxu0 }
 0x38d   :  { %v871_v12 = vadd.f32 %v1240_v42, %v870_v11  ;;  %1482 = vmatprep.mubr.msk.f32.mxu1 %vm273_vm1, %v907_v7 }
 0x38e   :  { %1483 = vmatmul.mubr.msk.f32.gmra.mrb[34].mxu1 %vm273_vm1, %v908_v9  ;;  %v910_v15 = vmax.f32 %v876_v10, 0.0 }
 0x38f   :  { %v909_v13 = vmax.f32 %v871_v12, 0.0  ;;  %v1464_v14 = vpop.f32.mrb[34].mxu0 }
 0x390   :  { %v886_v16 = vadd.f32 %v1464_v14, %v1240_v42  ;;  %v880_v17 = vpop.f32.mrb[35].mxu0 }
 0x391   :  { %v881_v18 = vadd.f32 %v1240_v42, %v880_v17  ;;  %1485 = vmatprep.mubr.msk.f32.mxu1 %vm273_vm1, %v909_v13 }
 0x392   :  { %1486 = vmatmul.mubr.msk.f32.gmra.mrb[36].mxu1 %vm273_vm1, %v910_v15  ;;  %v912_v21 = vmax.f32 %v886_v16, 0.0 }
 0x393   :  { %v911_v19 = vmax.f32 %v881_v18, 0.0  ;;  %v1467_v20 = vpop.f32.mrb[36].mxu0 }
 0x394   :  { %v896_v22 = vadd.f32 %v1467_v20, %v1240_v42  ;;  %v890_v23 = vpop.f32.mrb[37].mxu0 }
 0x395   :  { %v891_v24 = vadd.f32 %v1240_v42, %v890_v23  ;;  %1488 = vmatprep.mubr.msk.f32.mxu1 %vm273_vm1, %v911_v19 }
 0x396   :  { %1489 = vmatmul.mubr.msk.f32.gmra.mrb[38].mxu1 %vm273_vm1, %v912_v21  ;;  %v914_v26 = vmax.f32 %v896_v22, 0.0 }
 0x397   :  { %v913_v25 = vmax.f32 %v891_v24, 0.0 }
 0x399   :  { %1491 = vmatprep.mubr.msk.f32.mxu1 %vm273_vm1, %v913_v25 }
 0x39a   :  { %1492 = vmatmul.mubr.msk.f32.gmra.mrb[40].mxu1 %vm273_vm1, %v914_v26 }
 0x451   :  { %v1472_v27 = vpop.f32.mrb[26].mxu1 }
 0x452   :  { %v1036_v29 = vpop.f32.mrb[27].mxu1  ;;  %v1042_v30 = vadd.f32 %v1472_v27, %v1258_v28 }
 0x453   :  { %v1037_v31 = vadd.f32 %v1258_v28, %v1036_v29 }
 0x454   :  { %v1116_v36 = vsel %vm273_vm1, %v1042_v30, -inf }
 0x455   :  { %v1475_v32 = vpop.f32.mrb[28].mxu1  ;;  %v1115_v38 = vsel %vm273_vm1, %v1037_v31, -inf }
 0x456   :  { %v1052_v33 = vadd.f32 %v1475_v32, %v1258_v28  ;;  %v1046_v34 = vpop.f32.mrb[29].mxu1 }
 0x457   :  { %v1047_v35 = vadd.f32 %v1258_v28, %v1046_v34 }
 0x458   :  { %v1119_v37 = vsel %vm273_vm1, %v1052_v33, -inf }
 0x459   :  { %v1120_v39 = vmax.f32 %v1116_v36, %v1119_v37  ;;  %v1117_v40 = vsel %vm273_vm1, %v1047_v35, -inf  ;;  %v1478_v41 = vpop.f32.mrb[30].mxu1  ;;  %v1158_v37 = vstv %s1157_s3 }
 0x45a   :  { %v1118_v42 = vmax.f32 %v1115_v38, %v1117_v40  ;;  %v1062_v43 = vadd.f32 %v1478_v41, %v1258_v28  ;;  %v1056_v44 = vpop.f32.mrb[31].mxu1  ;;  %v1162_v40 = vstv %s1275_s21 }
 0x45b   :  { %v1057_v45 = vadd.f32 %v1258_v28, %v1056_v44 }
 0x45c   :  { %v1123_v46 = vsel %vm273_vm1, %v1062_v43, -inf }
 0x45d   :  { %v1124_v47 = vmax.f32 %v1120_v39, %v1123_v46  ;;  %v1121_v48 = vsel %vm273_vm1, %v1057_v45, -inf  ;;  %v1481_v49 = vpop.f32.mrb[32].mxu1 }
 0x45e   :  { %v1122_v50 = vmax.f32 %v1118_v42, %v1121_v48  ;;  %v1072_v51 = vadd.f32 %v1481_v49, %v1258_v28  ;;  %v1066_v52 = vpop.f32.mrb[33].mxu1 }
 0x45f   :  { %v1067_v53 = vadd.f32 %v1258_v28, %v1066_v52 }
 0x460   :  { %v1127_v54 = vsel %vm273_vm1, %v1072_v51, -inf }
 0x461   :  { %v1128_v55 = vmax.f32 %v1124_v47, %v1127_v54  ;;  %v1125_v56 = vsel %vm273_vm1, %v1067_v53, -inf  ;;  %v1484_v57 = vpop.f32.mrb[34].mxu1 }
 0x462   :  { %v1126_v58 = vmax.f32 %v1122_v50, %v1125_v56  ;;  %v1076_v59 = vpop.f32.mrb[35].mxu1  ;;  %v1082_v61 = vadd.f32 %v1484_v57, %v1258_v28 }
 0x463   :  { %v1077_v62 = vadd.f32 %v1258_v28, %v1076_v59 }
 0x464   :  { %v1129_v60 = vmax.f32 %v1126_v58, %v1128_v55  ;;  %v1137_v4 = vsel %vm273_vm1, %v1082_v61, -inf }
 0x465   :  { %v1487_v63 = vpop.f32.mrb[36].mxu1  ;;  %v1136_v6 = vsel %vm273_vm1, %v1077_v62, -inf }
 0x466   :  { %v1092_v0 = vadd.f32 %v1487_v63, %v1258_v28  ;;  %v1086_v1 = vpop.f32.mrb[37].mxu1  ;;  %v1130_v3 = vrot.slane %v1129_v60, 4 }
 0x467   :  { %v1087_v2 = vadd.f32 %v1258_v28, %v1086_v1 }
 0x468   :  { %v1140_v5 = vsel %vm273_vm1, %v1092_v0, -inf  ;;  %v1131_v14 = vmax.f32 %v1129_v60, %v1130_v3 }
 0x469   :  { %v1141_v7 = vmax.f32 %v1137_v4, %v1140_v5  ;;  %v1138_v8 = vsel %vm273_vm1, %v1087_v2, -inf  ;;  %v1490_v9 = vpop.f32.mrb[38].mxu1 }
 0x46a   :  { %v1139_v10 = vmax.f32 %v1136_v6, %v1138_v8  ;;  %v1102_v11 = vadd.f32 %v1490_v9, %v1258_v28  ;;  %v1096_v12 = vpop.f32.mrb[39].mxu1  ;;  %v1132_v23 = vrot.slane %v1131_v14, 2 }
 0x46b   :  { %v1097_v13 = vadd.f32 %v1258_v28, %v1096_v12 }
 0x46c   :  { %v1144_v15 = vsel %vm273_vm1, %v1102_v11, -inf  ;;  %v1133_v29 = vmax.f32 %v1131_v14, %v1132_v23 }
 0x46d   :  { %v1145_v16 = vmax.f32 %v1141_v7, %v1144_v15  ;;  %v1142_v17 = vsel %vm273_vm1, %v1097_v13, -inf  ;;  %v1493_v18 = vpop.f32.mrb[40].mxu1 }
 0x46e   :  { %v1143_v19 = vmax.f32 %v1139_v10, %v1142_v17  ;;  %v1112_v20 = vadd.f32 %v1493_v18, %v1258_v28  ;;  %v1106_v21 = vpop.f32.mrb[41].mxu1  ;;  %v1134_v32 = vrot.slane %v1133_v29, 1 }
 0x46f   :  { %v1107_v22 = vadd.f32 %v1258_v28, %v1106_v21 }
 0x470   :  { %v1148_v24 = vsel %vm273_vm1, %v1112_v20, -inf  ;;  %v1135_v36 = vmax.f32 %v1133_v29, %v1134_v32 }
 0x471   :  { %v1149_v25 = vmax.f32 %v1145_v16, %v1148_v24  ;;  %v1146_v26 = vsel %vm273_vm1, %v1107_v22, -inf }
 0x472   :  { %v1147_v27 = vmax.f32 %v1143_v19, %v1146_v26  ;;  %v1159_v39 = vmul.f32 %v1158_v37, %v1135_v36 }
 0x474   :  { %v1150_v30 = vmax.f32 %v1147_v27, %v1149_v25  ;;  %v1163_v42 = vadd.f32 %v1162_v40, %v1159_v39 }
 0x476   :  { %v1151_v31 = vrot.slane %v1150_v30, 4 }
 0x478   :  { %v1152_v33 = vmax.f32 %v1150_v30, %v1151_v31 }
 0x47a   :  { %v1153_v34 = vrot.slane %v1152_v33, 2 }
 0x47c   :  { %v1154_v35 = vmax.f32 %v1152_v33, %v1153_v34 }
 0x47e   :  { %v1155_v38 = vrot.slane %v1154_v35, 1 }
 0x480   :  { %v1156_v28 = vmax.f32 %v1154_v35, %v1155_v38 }
 0x482   :  { %v1160_v41 = vmul.f32 %v1158_v37, %v1156_v28 }
 0x484   :  { %v1164_v43 = vadd.f32 %v1162_v40, %v1160_v41 }
 0x486   :  { %v1168_v44 = vsel %vm1167_vm2, %v1164_v43, %v1163_v42 }
 0x487   :  { %1171 = vst.msk [vmem:[#allocation5] sm:$0x3] %vm1170_vm3, %v1168_v44 }
 0x488   :  { %1525 = shalt.err (!%p1522_p9)
}
 0x489   :  { %s1526_s4 = scalar_lea.hbm %s1769_s5, 32 }
 0x48a   :  { %p1527_p10 = scmp.ne.s32.totalorder %s1769_s5, %s1526_s4  ;;  %p1530_p11 = scmp.lt.u32.totalorder %s1526_s4, %s1769_s5 }
 0x48c   :  { %p1532_p12 = pnand %p1530_p11, %p1527_p10 }
 0x48e   :  { %1535 = shalt.err (!%p1532_p12)
}
 0x48f   :  { %1181 = dma.vmem_to_hbm [thread:$0]  %s1179_s23, 32, %s1769_s5, [#allocation3]  }
 0x490   :  { %1538 = dma.done.wait [#allocation3], 32  }
 0x491   :  { %1539 = vsyncadd [#allocation3], 4294967264 }
 0x492   :  { %1185 = vsyncpa [#allocation3], 1 }
 0x493   :  { %1186 = vsyncpa [#allocation4], 1 }

</bundles_post_ra>
